<compile_context>
chip_gen: v7x
topology: tpu7x:2x2x1
jax: 0.10.0
libtpu: 0.0.40
codegen_flags: <defaults>
</compile_context>

<pallas_src>
import jax
import jax.numpy as jnp
from jax.experimental import pallas as pl
from jax.experimental.pallas import tpu as pltpu

# (before, after) pad amounts for C, H, W — matches F.pad(x, (3, 3, 4, 10, 3, 5))
PAD_C = (3, 5)
PAD_H = (4, 10)
PAD_W = (3, 3)


def pad_kernel(x_ref, o_ref):
    x = x_ref[...]                                   # (N, C, H, W)
    N, C, H, W = x.shape
    dt = x.dtype

    # Build the padded tile in registers, then store it once: no double write,
    # no separate unaligned interior re-store.
    # W pad (lane axis)
    x = jnp.concatenate(
        [jnp.zeros((N, C, H, PAD_W[0]), dt), x,
         jnp.zeros((N, C, H, PAD_W[1]), dt)], axis=3)
    Wp = W + PAD_W[0] + PAD_W[1]
    # H pad (sublane axis)
    x = jnp.concatenate(
        [jnp.zeros((N, C, PAD_H[0], Wp), dt), x,
         jnp.zeros((N, C, PAD_H[1], Wp), dt)], axis=2)
    Hp = H + PAD_H[0] + PAD_H[1]
    # C pad (untiled axis — plain block stacking)
    x = jnp.concatenate(
        [jnp.zeros((N, PAD_C[0], Hp, Wp), dt), x,
         jnp.zeros((N, PAD_C[1], Hp, Wp), dt)], axis=1)

    o_ref[...] = x                                   # single full-tile store


def padtest(x):
    N, C, H, W = x.shape
    Co = C + PAD_C[0] + PAD_C[1]
    Ho = H + PAD_H[0] + PAD_H[1]
    Wo = W + PAD_W[0] + PAD_W[1]
    return pl.pallas_call(
        pad_kernel,
        out_shape=jax.ShapeDtypeStruct((N, Co, Ho, Wo), x.dtype),
        # grid=(): single invocation, whole arrays as one VMEM block each
        # (full-array blocks are exempt from the (8,128) divisibility rule).
        in_specs=[pl.BlockSpec((N, C, H, W), lambda: (0, 0, 0, 0))],
        out_specs=pl.BlockSpec((N, Co, Ho, Wo), lambda: (0, 0, 0, 0)),
        compiler_params=pltpu.CompilerParams(
            vmem_limit_bytes=16 * 1024 * 1024),
    )(x)


if __name__ == "__main__":
    key = jax.random.PRNGKey(0)
    x = jax.random.normal(key, (2, 4, 16, 16), dtype=jnp.float32)

    out = jax.block_until_ready(padtest(x))

    # Reference check against jnp.pad with identical semantics.
    ref = jnp.pad(x, ((0, 0), PAD_C, PAD_H, PAD_W))
    assert out.shape == (2, 12, 30, 22), out.shape
    assert jnp.allclose(out, ref), "mismatch vs reference pad"

    print("KERNEL_OK")
</pallas_src>

<mosaic_0001>
module attributes {stable_mosaic.version = 11 : i64} {
  func.func @pad_kernel(%arg0: memref<2x4x16x16xf32, #tpu.memory_space<vmem>>, %arg1: memref<2x12x30x22xf32, #tpu.memory_space<vmem>>) attributes {dimension_semantics = [], scalar_prefetch = 0 : i64, scratch_operands = 0 : i64, tpu.core_type = #tpu.core_type<tc>} {
    %c0 = arith.constant 0 : index
    %c0_0 = arith.constant 0 : index
    %c0_1 = arith.constant 0 : index
    %c0_2 = arith.constant 0 : index
    %0 = vector.load %arg0[%c0, %c0_0, %c0_1, %c0_2] : memref<2x4x16x16xf32, #tpu.memory_space<vmem>>, vector<2x4x16x16xf32>
    %cst = arith.constant 0.000000e+00 : f32
    %1 = vector.broadcast %cst : f32 to vector<2x4x16x3xf32>
    %cst_3 = arith.constant 0.000000e+00 : f32
    %2 = vector.broadcast %cst_3 : f32 to vector<2x4x16x3xf32>
    %3 = tpu.concatenate %1, %0, %2 in 3 : vector<2x4x16x3xf32>, vector<2x4x16x16xf32>, vector<2x4x16x3xf32> -> vector<2x4x16x22xf32>
    %cst_4 = arith.constant 0.000000e+00 : f32
    %4 = vector.broadcast %cst_4 : f32 to vector<2x4x4x22xf32>
    %cst_5 = arith.constant 0.000000e+00 : f32
    %5 = vector.broadcast %cst_5 : f32 to vector<2x4x10x22xf32>
    %6 = tpu.concatenate %4, %3, %5 in 2 : vector<2x4x4x22xf32>, vector<2x4x16x22xf32>, vector<2x4x10x22xf32> -> vector<2x4x30x22xf32>
    %cst_6 = arith.constant 0.000000e+00 : f32
    %7 = vector.broadcast %cst_6 : f32 to vector<2x3x30x22xf32>
    %cst_7 = arith.constant 0.000000e+00 : f32
    %8 = vector.broadcast %cst_7 : f32 to vector<2x5x30x22xf32>
    %9 = tpu.concatenate %7, %6, %8 in 1 : vector<2x3x30x22xf32>, vector<2x4x30x22xf32>, vector<2x5x30x22xf32> -> vector<2x12x30x22xf32>
    %c0_8 = arith.constant 0 : index
    %c0_9 = arith.constant 0 : index
    %c0_10 = arith.constant 0 : index
    %c0_11 = arith.constant 0 : index
    %10 = vector.load %arg1[%c0_8, %c0_9, %c0_10, %c0_11] : memref<2x12x30x22xf32, #tpu.memory_space<vmem>>, vector<2x12x30x22xf32>
    tpu.vector_store %arg1[%c0_8, %c0_9, %c0_10, %c0_11], %9 {strides = array<i32>} : memref<2x12x30x22xf32, #tpu.memory_space<vmem>>, vector<2x12x30x22xf32>,
    return
  }
}

</mosaic_0001>

<bundles_post_ra>
// kernel: tpu_custom_call.1
= control target key start
LH: loop header
LB: loop body
LE: loop exit
PB: predicated region body
PF: predicated region fallthrough
CT: control target
= control target key end

     0   :  { %6 = vsyncpa [#allocation3], 0  ;;  %s349_s6 = smov [#allocation2]   ;;  %s888_s0 = inlined_call_operand.hbm [shape: f32[2,4,16,16], index: 0, kind: input, shape index: {}]   ;;  %s889_s1 = inlined_call_operand.vmem [shape: f32[2,12,30,22], index: 1, kind: output, shape index: {}]  }
   0x1   :  { %s12_s7 = sshll.u32 %s349_s6, 4  ;;  %s325_s10 = scalar_lea.hbm %s888_s0, 2048  ;;  %s13_s7 = int_to_ptr.vmem [resolvable:$true] %s12_s7 }
   0x2   :  { %p326_p0 = scmp.ne.s32.totalorder %s888_s0, %s325_s10  ;;  %p329_p1 = scmp.lt.u32.totalorder %s325_s10, %s888_s0 }
   0x4   :  { %p331_p2 = pnand %p329_p1, %p326_p0 }
   0x6   :  { %334 = shalt.err (!%p331_p2)
}
   0x7   :  { %s335_s15 = scalar_lea.vmem %s13_s7, 2048  ;;  %p340_p4 = scmp.lt.s32.totalorder %s13_s7, %s13_s7 }
   0x8   :  { %p336_p3 = scmp.ne.s32.totalorder %s13_s7, %s335_s15  ;;  %p341_p5 = scmp.lt.s32.totalorder %s335_s15, %s335_s15 }
   0xa   :  { %p342_p6 = por %p341_p5, %p340_p4 }
   0xc   :  { %p343_p7 = pnand %p342_p6, %p336_p3 }
   0xe   :  { %346 = shalt.err (!%p343_p7)
}
   0xf   :  { %s350_s16 = smov 128   ;;  %s351_s17 = smov 8  }
  0x10   :  { %18 = dma.hbm_to_vmem [thread:$0]  %s888_s0, 2048, %s13_s7, [#allocation3], %s350_s16, %s350_s16, %s351_s17  }
  0x11   :  { %347 = dma.done.wait [#allocation3], 2048  }
  0x12   :  { %348 = vsyncadd [#allocation3], 4294965248  ;;  %vm221_vm0 = vcmask 177152   ;;  %v352_v0 = vmov 0.0   ;;  %vm217_vm1 = vcmask 179200   ;;  %v24_v1 = vld [vmem:[#allocation2 + $0x10] sm:$0xff] }
  0x13   :  { %222 = vst.msk [vmem:[%s889_s1 + $0x18] sm:$0x3f] %vm221_vm0, %v352_v0  ;;  %226 = vst.msk [vmem:[%s889_s1 + $0x38] sm:$0x3f] %vm221_vm0, %v352_v0  ;;  %v22_v2 = vld [vmem:[#allocation2] sm:$0xff]  ;;  %s353_s14 = smov 3  }
  0x14   :  { %230 = vst.msk [vmem:[%s889_s1 + $0x58] sm:$0x3f] %vm221_vm0, %v352_v0  ;;  %234 = vst.msk [vmem:[%s889_s1 + $0x78] sm:$0x3f] %vm221_vm0, %v352_v0  ;;  %58 = vrot.lane.b32.xlu1 %v24_v1, %s353_s14  ;;  %54 = vrot.lane.b32.xlu0 %v22_v2, %s353_s14  ;;  %v25_v3 = vld [vmem:[#allocation2 + $0x18] sm:$0xff]  ;;  %v23_v4 = vld [vmem:[#allocation2 + $0x8] sm:$0xff] }
  0x15   :  { %238 = vst.msk [vmem:[%s889_s1 + $0x98] sm:$0x3f] %vm221_vm0, %v352_v0  ;;  %242 = vst.msk [vmem:[%s889_s1 + $0xb8] sm:$0x3f] %vm221_vm0, %v352_v0  ;;  %v27_v5 = vld [vmem:[#allocation2 + $0x28] sm:$0xff]  ;;  %v26_v6 = vld [vmem:[#allocation2 + $0x20] sm:$0xff] }
  0x16   :  { %246 = vst.msk [vmem:[%s889_s1 + $0xd8] sm:$0x3f] %vm221_vm0, %v352_v0  ;;  %250 = vst.msk [vmem:[%s889_s1 + $0xf8] sm:$0x3f] %vm221_vm0, %v352_v0  ;;  %v29_v7 = vld [vmem:[#allocation2 + $0x38] sm:$0xff]  ;;  %v28_v8 = vld [vmem:[#allocation2 + $0x30] sm:$0xff] }
  0x17   :  { %254 = vst.msk [vmem:[%s889_s1 + $0x118] sm:$0x3f] %vm221_vm0, %v352_v0  ;;  %258 = vst.msk [vmem:[%s889_s1 + $0x138] sm:$0x3f] %vm221_vm0, %v352_v0  ;;  %v31_v9 = vld [vmem:[#allocation2 + $0x48] sm:$0xff]  ;;  %v30_v10 = vld [vmem:[#allocation2 + $0x40] sm:$0xff] }
  0x18   :  { %262 = vst.msk [vmem:[%s889_s1 + $0x158] sm:$0x3f] %vm221_vm0, %v352_v0  ;;  %266 = vst.msk [vmem:[%s889_s1 + $0x178] sm:$0x3f] %vm221_vm0, %v352_v0  ;;  %60 = vrot.lane.b32.xlu1 %v25_v3, %s353_s14  ;;  %56 = vrot.lane.b32.xlu0 %v23_v4, %s353_s14  ;;  %v33_v11 = vld [vmem:[#allocation2 + $0x58] sm:$0xff]  ;;  %v32_v12 = vld [vmem:[#allocation2 + $0x50] sm:$0xff] }
  0x19   :  { %270 = vst.msk [vmem:[%s889_s1 + $0x198] sm:$0x3f] %vm221_vm0, %v352_v0  ;;  %274 = vst.msk [vmem:[%s889_s1 + $0x1b8] sm:$0x3f] %vm221_vm0, %v352_v0  ;;  %v35_v13 = vld [vmem:[#allocation2 + $0x68] sm:$0xff]  ;;  %v34_v14 = vld [vmem:[#allocation2 + $0x60] sm:$0xff] }
  0x1a   :  { %278 = vst.msk [vmem:[%s889_s1 + $0x1d8] sm:$0x3f] %vm221_vm0, %v352_v0  ;;  %282 = vst.msk [vmem:[%s889_s1 + $0x1f8] sm:$0x3f] %vm221_vm0, %v352_v0  ;;  %v37_v15 = vld [vmem:[#allocation2 + $0x78] sm:$0xff]  ;;  %v36_v16 = vld [vmem:[#allocation2 + $0x70] sm:$0xff] }
  0x1b   :  { %286 = vst.msk [vmem:[%s889_s1 + $0x218] sm:$0x3f] %vm221_vm0, %v352_v0  ;;  %290 = vst.msk [vmem:[%s889_s1 + $0x238] sm:$0x3f] %vm221_vm0, %v352_v0  ;;  %vm102_vm2 = vcmask 23552   ;;  %vm119_vm3 = vcmask 154624  }
  0x1c   :  { %294 = vst.msk [vmem:[%s889_s1 + $0x258] sm:$0x3f] %vm221_vm0, %v352_v0  ;;  %298 = vst.msk [vmem:[%s889_s1 + $0x278] sm:$0x3f] %vm221_vm0, %v352_v0  ;;  %64 = vrot.lane.b32.xlu1 %v27_v5, %s353_s14  ;;  %62 = vrot.lane.b32.xlu0 %v26_v6, %s353_s14  ;;  %vm152_vm4 = vcmask 1043456  }
  0x1d   :  { %302 = vst.msk [vmem:[%s889_s1 + $0x298] sm:$0x3f] %vm221_vm0, %v352_v0  ;;  %306 = vst.msk [vmem:[%s889_s1 + $0x2b8] sm:$0x3f] %vm221_vm0, %v352_v0 }
  0x1e   :  { %310 = vst.msk [vmem:[%s889_s1 + $0x2d8] sm:$0x3f] %vm221_vm0, %v352_v0  ;;  %314 = vst.msk [vmem:[%s889_s1 + $0x2f8] sm:$0x3f] %vm221_vm0, %v352_v0 }
  0x1f   :  { %218 = vst.msk [vmem:[%s889_s1] sm:$0xff] %vm217_vm1, %v352_v0  ;;  %219 = vst.msk [vmem:[%s889_s1 + $0x8] sm:$0xff] %vm217_vm1, %v352_v0 }
  0x20   :  { %220 = vst.msk [vmem:[%s889_s1 + $0x10] sm:$0xff] %vm217_vm1, %v352_v0  ;;  %223 = vst.msk [vmem:[%s889_s1 + $0x20] sm:$0xff] %vm217_vm1, %v352_v0  ;;  %68 = vrot.lane.b32.xlu1 %v29_v7, %s353_s14  ;;  %66 = vrot.lane.b32.xlu0 %v28_v8, %s353_s14 }
  0x21   :  { %224 = vst.msk [vmem:[%s889_s1 + $0x28] sm:$0xff] %vm217_vm1, %v352_v0  ;;  %225 = vst.msk [vmem:[%s889_s1 + $0x30] sm:$0xff] %vm217_vm1, %v352_v0 }
  0x22   :  { %227 = vst.msk [vmem:[%s889_s1 + $0x40] sm:$0xff] %vm217_vm1, %v352_v0  ;;  %228 = vst.msk [vmem:[%s889_s1 + $0x48] sm:$0xff] %vm217_vm1, %v352_v0 }
  0x23   :  { %229 = vst.msk [vmem:[%s889_s1 + $0x50] sm:$0xff] %vm217_vm1, %v352_v0  ;;  %247 = vst.msk [vmem:[%s889_s1 + $0xe0] sm:$0xff] %vm217_vm1, %v352_v0 }
  0x24   :  { %248 = vst.msk [vmem:[%s889_s1 + $0xe8] sm:$0xff] %vm217_vm1, %v352_v0  ;;  %249 = vst.msk [vmem:[%s889_s1 + $0xf0] sm:$0xff] %vm217_vm1, %v352_v0  ;;  %72 = vrot.lane.b32.xlu1 %v31_v9, %s353_s14  ;;  %70 = vrot.lane.b32.xlu0 %v30_v10, %s353_s14 }
  0x25   :  { %251 = vst.msk [vmem:[%s889_s1 + $0x100] sm:$0xff] %vm217_vm1, %v352_v0  ;;  %252 = vst.msk [vmem:[%s889_s1 + $0x108] sm:$0xff] %vm217_vm1, %v352_v0 }
  0x26   :  { %253 = vst.msk [vmem:[%s889_s1 + $0x110] sm:$0xff] %vm217_vm1, %v352_v0  ;;  %255 = vst.msk [vmem:[%s889_s1 + $0x120] sm:$0xff] %vm217_vm1, %v352_v0 }
  0x27   :  { %256 = vst.msk [vmem:[%s889_s1 + $0x128] sm:$0xff] %vm217_vm1, %v352_v0  ;;  %257 = vst.msk [vmem:[%s889_s1 + $0x130] sm:$0xff] %vm217_vm1, %v352_v0 }
  0x28   :  { %259 = vst.msk [vmem:[%s889_s1 + $0x140] sm:$0xff] %vm217_vm1, %v352_v0  ;;  %260 = vst.msk [vmem:[%s889_s1 + $0x148] sm:$0xff] %vm217_vm1, %v352_v0  ;;  %76 = vrot.lane.b32.xlu1 %v33_v11, %s353_s14  ;;  %74 = vrot.lane.b32.xlu0 %v32_v12, %s353_s14 }
  0x29   :  { %261 = vst.msk [vmem:[%s889_s1 + $0x150] sm:$0xff] %vm217_vm1, %v352_v0  ;;  %263 = vst.msk [vmem:[%s889_s1 + $0x160] sm:$0xff] %vm217_vm1, %v352_v0 }
  0x2a   :  { %264 = vst.msk [vmem:[%s889_s1 + $0x168] sm:$0xff] %vm217_vm1, %v352_v0  ;;  %265 = vst.msk [vmem:[%s889_s1 + $0x170] sm:$0xff] %vm217_vm1, %v352_v0 }
  0x2b   :  { %267 = vst.msk [vmem:[%s889_s1 + $0x180] sm:$0xff] %vm217_vm1, %v352_v0  ;;  %268 = vst.msk [vmem:[%s889_s1 + $0x188] sm:$0xff] %vm217_vm1, %v352_v0 }
  0x2c   :  { %269 = vst.msk [vmem:[%s889_s1 + $0x190] sm:$0xff] %vm217_vm1, %v352_v0  ;;  %271 = vst.msk [vmem:[%s889_s1 + $0x1a0] sm:$0xff] %vm217_vm1, %v352_v0  ;;  %80 = vrot.lane.b32.xlu1 %v35_v13, %s353_s14  ;;  %78 = vrot.lane.b32.xlu0 %v34_v14, %s353_s14 }
  0x2d   :  { %272 = vst.msk [vmem:[%s889_s1 + $0x1a8] sm:$0xff] %vm217_vm1, %v352_v0  ;;  %273 = vst.msk [vmem:[%s889_s1 + $0x1b0] sm:$0xff] %vm217_vm1, %v352_v0 }
  0x2e   :  { %275 = vst.msk [vmem:[%s889_s1 + $0x1c0] sm:$0xff] %vm217_vm1, %v352_v0  ;;  %276 = vst.msk [vmem:[%s889_s1 + $0x1c8] sm:$0xff] %vm217_vm1, %v352_v0 }
  0x2f   :  { %277 = vst.msk [vmem:[%s889_s1 + $0x1d0] sm:$0xff] %vm217_vm1, %v352_v0  ;;  %295 = vst.msk [vmem:[%s889_s1 + $0x260] sm:$0xff] %vm217_vm1, %v352_v0 }
  0x30   :  { %296 = vst.msk [vmem:[%s889_s1 + $0x268] sm:$0xff] %vm217_vm1, %v352_v0  ;;  %297 = vst.msk [vmem:[%s889_s1 + $0x270] sm:$0xff] %vm217_vm1, %v352_v0  ;;  %84 = vrot.lane.b32.xlu1 %v37_v15, %s353_s14  ;;  %82 = vrot.lane.b32.xlu0 %v36_v16, %s353_s14 }
  0x31   :  { %299 = vst.msk [vmem:[%s889_s1 + $0x280] sm:$0xff] %vm217_vm1, %v352_v0  ;;  %300 = vst.msk [vmem:[%s889_s1 + $0x288] sm:$0xff] %vm217_vm1, %v352_v0 }
  0x32   :  { %301 = vst.msk [vmem:[%s889_s1 + $0x290] sm:$0xff] %vm217_vm1, %v352_v0  ;;  %303 = vst.msk [vmem:[%s889_s1 + $0x2a0] sm:$0xff] %vm217_vm1, %v352_v0 }
  0x33   :  { %304 = vst.msk [vmem:[%s889_s1 + $0x2a8] sm:$0xff] %vm217_vm1, %v352_v0  ;;  %305 = vst.msk [vmem:[%s889_s1 + $0x2b0] sm:$0xff] %vm217_vm1, %v352_v0 }
  0x34   :  { %307 = vst.msk [vmem:[%s889_s1 + $0x2c0] sm:$0xff] %vm217_vm1, %v352_v0  ;;  %308 = vst.msk [vmem:[%s889_s1 + $0x2c8] sm:$0xff] %vm217_vm1, %v352_v0 }
  0x35   :  { %309 = vst.msk [vmem:[%s889_s1 + $0x2d0] sm:$0xff] %vm217_vm1, %v352_v0  ;;  %311 = vst.msk [vmem:[%s889_s1 + $0x2e0] sm:$0xff] %vm217_vm1, %v352_v0 }
  0x36   :  { %312 = vst.msk [vmem:[%s889_s1 + $0x2e8] sm:$0xff] %vm217_vm1, %v352_v0  ;;  %313 = vst.msk [vmem:[%s889_s1 + $0x2f0] sm:$0xff] %vm217_vm1, %v352_v0 }
  0x86   :  { %v59_v17 = vpop.permute.xlu1 %58  ;;  %v55_v18 = vpop.permute.xlu0 %54 }
  0x87   :  { %v105_v19 = vsel %vm102_vm2, 0.0, %v59_v17  ;;  %v103_v20 = vsel %vm102_vm2, 0.0, %v55_v18 }
  0x88   :  { %v122_v21 = vsel %vm119_vm3, %v105_v19, 0.0  ;;  %v120_v22 = vsel %vm119_vm3, %v103_v20, 0.0 }
  0x89   :  { %v156_v23 = vrot.slane %v122_v21, 4  ;;  %v153_v24 = vrot.slane %v120_v22, 4 }
  0x8a   :  { %v61_v25 = vpop.permute.xlu1 %60  ;;  %v57_v26 = vpop.permute.xlu0 %56 }
  0x8b   :  { %v202_v27 = vsel %vm152_vm4, 0.0, %v156_v23  ;;  %v201_v28 = vsel %vm152_vm4, 0.0, %v153_v24  ;;  %v106_v29 = vsel %vm102_vm2, 0.0, %v61_v25  ;;  %v104_v30 = vsel %vm102_vm2, 0.0, %v57_v26 }
  0x8c   :  { %235 = vst.msk [vmem:[%s889_s1 + $0x80] sm:$0xff] %vm217_vm1, %v202_v27  ;;  %231 = vst.msk [vmem:[%s889_s1 + $0x60] sm:$0xff] %vm217_vm1, %v201_v28  ;;  %v123_v31 = vsel %vm119_vm3, %v106_v29, 0.0  ;;  %v121_v32 = vsel %vm119_vm3, %v104_v30, 0.0 }
  0x8d   :  { %v157_v33 = vrot.slane %v123_v31, 4  ;;  %v154_v34 = vrot.slane %v121_v32, 4 }
  0x8e   :  { %v65_v35 = vpop.permute.xlu1 %64  ;;  %v63_v36 = vpop.permute.xlu0 %62 }
  0x8f   :  { %v158_v37 = vsel %vm152_vm4, %v156_v23, %v157_v33  ;;  %v210_v38 = vsel %vm152_vm4, %v157_v33, 0.0  ;;  %v155_v39 = vsel %vm152_vm4, %v153_v24, %v154_v34  ;;  %v209_v40 = vsel %vm152_vm4, %v154_v34, 0.0 }
  0x90   :  { %236 = vst.msk [vmem:[%s889_s1 + $0x88] sm:$0xff] %vm217_vm1, %v158_v37  ;;  %237 = vst.msk [vmem:[%s889_s1 + $0x90] sm:$0xff] %vm217_vm1, %v210_v38  ;;  %v108_v41 = vsel %vm102_vm2, 0.0, %v65_v35  ;;  %v107_v42 = vsel %vm102_vm2, 0.0, %v63_v36 }
  0x91   :  { %232 = vst.msk [vmem:[%s889_s1 + $0x68] sm:$0xff] %vm217_vm1, %v155_v39  ;;  %233 = vst.msk [vmem:[%s889_s1 + $0x70] sm:$0xff] %vm217_vm1, %v209_v40  ;;  %v125_v43 = vsel %vm119_vm3, %v108_v41, 0.0  ;;  %v124_v44 = vsel %vm119_vm3, %v107_v42, 0.0 }
  0x92   :  { %v160_v45 = vrot.slane %v125_v43, 4  ;;  %v159_v46 = vrot.slane %v124_v44, 4  ;;  %v69_v47 = vpop.permute.xlu1 %68  ;;  %v67_v48 = vpop.permute.xlu0 %66 }
  0x93   :  { %v110_v49 = vsel %vm102_vm2, 0.0, %v69_v47  ;;  %v109_v50 = vsel %vm102_vm2, 0.0, %v67_v48 }
  0x94   :  { %v211_v51 = vsel %vm152_vm4, %v160_v45, 0.0  ;;  %v161_v52 = vsel %vm152_vm4, %v159_v46, %v160_v45  ;;  %v203_v53 = vsel %vm152_vm4, 0.0, %v159_v46  ;;  %v127_v54 = vsel %vm119_vm3, %v110_v49, 0.0 }
  0x95   :  { %241 = vst.msk [vmem:[%s889_s1 + $0xb0] sm:$0xff] %vm217_vm1, %v211_v51  ;;  %239 = vst.msk [vmem:[%s889_s1 + $0xa0] sm:$0xff] %vm217_vm1, %v203_v53  ;;  %v163_v55 = vrot.slane %v127_v54, 4  ;;  %v126_v56 = vsel %vm119_vm3, %v109_v50, 0.0 }
  0x96   :  { %240 = vst.msk [vmem:[%s889_s1 + $0xa8] sm:$0xff] %vm217_vm1, %v161_v52  ;;  %v162_v57 = vrot.slane %v126_v56, 4  ;;  %v73_v58 = vpop.permute.xlu1 %72  ;;  %v71_v59 = vpop.permute.xlu0 %70 }
  0x97   :  { %v212_v60 = vsel %vm152_vm4, %v163_v55, 0.0  ;;  %v112_v61 = vsel %vm102_vm2, 0.0, %v73_v58  ;;  %v111_v62 = vsel %vm102_vm2, 0.0, %v71_v59 }
  0x98   :  { %245 = vst.msk [vmem:[%s889_s1 + $0xd0] sm:$0xff] %vm217_vm1, %v212_v60  ;;  %v164_v63 = vsel %vm152_vm4, %v162_v57, %v163_v55  ;;  %v204_v0 = vsel %vm152_vm4, 0.0, %v162_v57  ;;  %v129_v1 = vsel %vm119_vm3, %v112_v61, 0.0  ;;  %v128_v2 = vsel %vm119_vm3, %v111_v62, 0.0 }
  0x99   :  { %243 = vst.msk [vmem:[%s889_s1 + $0xc0] sm:$0xff] %vm217_vm1, %v204_v0  ;;  %244 = vst.msk [vmem:[%s889_s1 + $0xc8] sm:$0xff] %vm217_vm1, %v164_v63  ;;  %v166_v3 = vrot.slane %v129_v1, 4  ;;  %v165_v4 = vrot.slane %v128_v2, 4 }
  0x9a   :  { %v77_v5 = vpop.permute.xlu1 %76  ;;  %v75_v6 = vpop.permute.xlu0 %74 }
  0x9b   :  { %v213_v7 = vsel %vm152_vm4, %v166_v3, 0.0  ;;  %v167_v8 = vsel %vm152_vm4, %v165_v4, %v166_v3  ;;  %v205_v9 = vsel %vm152_vm4, 0.0, %v165_v4  ;;  %v114_v10 = vsel %vm102_vm2, 0.0, %v77_v5 }
  0x9c   :  { %281 = vst.msk [vmem:[%s889_s1 + $0x1f0] sm:$0xff] %vm217_vm1, %v213_v7  ;;  %279 = vst.msk [vmem:[%s889_s1 + $0x1e0] sm:$0xff] %vm217_vm1, %v205_v9  ;;  %v131_v11 = vsel %vm119_vm3, %v114_v10, 0.0  ;;  %v113_v12 = vsel %vm102_vm2, 0.0, %v75_v6 }
  0x9d   :  { %280 = vst.msk [vmem:[%s889_s1 + $0x1e8] sm:$0xff] %vm217_vm1, %v167_v8  ;;  %v169_v13 = vrot.slane %v131_v11, 4  ;;  %v130_v14 = vsel %vm119_vm3, %v113_v12, 0.0 }
  0x9e   :  { %v168_v15 = vrot.slane %v130_v14, 4  ;;  %v81_v16 = vpop.permute.xlu1 %80  ;;  %v79_v17 = vpop.permute.xlu0 %78 }
  0x9f   :  { %v214_v18 = vsel %vm152_vm4, %v169_v13, 0.0  ;;  %v116_v19 = vsel %vm102_vm2, 0.0, %v81_v16  ;;  %v115_v20 = vsel %vm102_vm2, 0.0, %v79_v17 }
  0xa0   :  { %285 = vst.msk [vmem:[%s889_s1 + $0x210] sm:$0xff] %vm217_vm1, %v214_v18  ;;  %v170_v21 = vsel %vm152_vm4, %v168_v15, %v169_v13  ;;  %v206_v22 = vsel %vm152_vm4, 0.0, %v168_v15  ;;  %v133_v23 = vsel %vm119_vm3, %v116_v19, 0.0  ;;  %v132_v24 = vsel %vm119_vm3, %v115_v20, 0.0 }
  0xa1   :  { %283 = vst.msk [vmem:[%s889_s1 + $0x200] sm:$0xff] %vm217_vm1, %v206_v22  ;;  %284 = vst.msk [vmem:[%s889_s1 + $0x208] sm:$0xff] %vm217_vm1, %v170_v21  ;;  %v172_v25 = vrot.slane %v133_v23, 4  ;;  %v171_v26 = vrot.slane %v132_v24, 4 }
  0xa2   :  { %v85_v27 = vpop.permute.xlu1 %84  ;;  %v83_v28 = vpop.permute.xlu0 %82 }
  0xa3   :  { %v215_v29 = vsel %vm152_vm4, %v172_v25, 0.0  ;;  %v173_v30 = vsel %vm152_vm4, %v171_v26, %v172_v25  ;;  %v207_v31 = vsel %vm152_vm4, 0.0, %v171_v26  ;;  %v118_v32 = vsel %vm102_vm2, 0.0, %v85_v27 }
  0xa4   :  { %289 = vst.msk [vmem:[%s889_s1 + $0x230] sm:$0xff] %vm217_vm1, %v215_v29  ;;  %287 = vst.msk [vmem:[%s889_s1 + $0x220] sm:$0xff] %vm217_vm1, %v207_v31  ;;  %v135_v33 = vsel %vm119_vm3, %v118_v32, 0.0  ;;  %v117_v34 = vsel %vm102_vm2, 0.0, %v83_v28 }
  0xa5   :  { %288 = vst.msk [vmem:[%s889_s1 + $0x228] sm:$0xff] %vm217_vm1, %v173_v30  ;;  %v175_v35 = vrot.slane %v135_v33, 4  ;;  %v134_v36 = vsel %vm119_vm3, %v117_v34, 0.0 }
  0xa6   :  { %v174_v37 = vrot.slane %v134_v36, 4 }
  0xa7   :  { %v216_v38 = vsel %vm152_vm4, %v175_v35, 0.0 }
  0xa8   :  { %293 = vst.msk [vmem:[%s889_s1 + $0x250] sm:$0xff] %vm217_vm1, %v216_v38  ;;  %v176_v39 = vsel %vm152_vm4, %v174_v37, %v175_v35  ;;  %v208_v40 = vsel %vm152_vm4, 0.0, %v174_v37 }
  0xa9   :  { %291 = vst.msk [vmem:[%s889_s1 + $0x240] sm:$0xff] %vm217_vm1, %v208_v40  ;;  %292 = vst.msk [vmem:[%s889_s1 + $0x248] sm:$0xff] %vm217_vm1, %v176_v39 }
  0xaa   :  { %319 = vsyncpa [#allocation3], 1 }

</bundles_post_ra>
